<compile_context>
chip_gen: v7x
topology: tpu7x:2x2x1
jax: 0.10.0
libtpu: 0.0.40
codegen_flags: <defaults>
</compile_context>

<pallas_src>
import functools

import jax
import jax.numpy as jnp
from jax.experimental import pallas as pl
from jax.experimental.pallas import tpu as pltpu

BN_EPS = 1e-5


def _round_up(v, m):
    return (v + m - 1) // m * m


def _vmem_budget_bytes():
    """~75% of physical VMEM (v7x: ~48 MiB, v5e/v6e: ~96 MiB)."""
    try:
        cap = int(pltpu.get_tpu_info().vmem_capacity_bytes)
    except Exception:
        cap = 64 << 20                      # conservative, valid on every gen
    return max(32 << 20, int(0.75 * cap))


def _fir_in_bf16():
    """bf16 tap multiplies only on chips with a bf16 VALU (v6e/v7x)."""
    try:
        kind = jax.devices()[0].device_kind.lower()
    except Exception:
        kind = ""
    return not any(tag in kind for tag in ("v2", "v3", "v4", "v5"))


def conv_stats_kernel(x_ref, dww_ref, pww_ref, z_ref, psum_ref, psq_ref, *,
                      k_size, t_tile, t_valid, t_padded, fir_bf16):
    """Depthwise FIR + pointwise 1x1 conv + BN partial sums.

      x_ref    : (C_in, T_in_tile_p)  bf16 halo'd input window (one batch, tile)
      dww_ref  : (C_in, K)            bf16 (v6e/v7x) or f32 (v5e) taps
      pww_ref  : (C_out, C_in)        bf16 pointwise weights
      z_ref    : (C_out, t_tile)      bf16 pre-BN activations
      psum_ref : (C_out, 1)           f32 per-batch partial sum       (accum)
      psq_ref  : (C_out, 1)           f32 per-batch partial sum of sq (accum)
    """
    j = pl.program_id(1)

    x = x_ref[...]                                    # (C_in, T_in_tile_p) bf16
    w = dww_ref[...]                                  # (C_in, K)

    # Depthwise FIR along T.  Tap multiplies stay bf16 where the VALU supports
    # it; accumulation is always f32.  Static unrolled taps.
    def tap(k):
        xk = x[:, k:k + t_tile]
        if fir_bf16:
            return (xk * w[:, k:k + 1]).astype(jnp.float32)
        return xk.astype(jnp.float32) * w[:, k:k + 1].astype(jnp.float32)

    y = tap(0)
    for k in range(1, k_size):
        y = y + tap(k)

    # Pointwise 1x1 conv == one lane-dense 2-D MXU matmul, bf16 in / f32 acc.
    z = jnp.dot(pww_ref[...], y.astype(jnp.bfloat16),
                preferred_element_type=jnp.float32)   # (C_out, t_tile) f32
    z_ref[...] = z.astype(z_ref.dtype)                # bf16 writeback

    # BN partial statistics in f32; mask the padded T tail so it does not bias
    # the statistics (only needed when t was padded up).
    if t_valid < t_padded:
        pos = jax.lax.broadcasted_iota(jnp.int32, z.shape, 1) + j * t_tile
        keep = pos < t_valid
        zm = jnp.where(keep, z, 0.0)
        zsq = jnp.where(keep, z * z, 0.0)
    else:
        zm, zsq = z, z * z

    @pl.when(j == 0)
    def _init():
        psum_ref[...] = jnp.zeros_like(psum_ref)
        psq_ref[...] = jnp.zeros_like(psq_ref)

    psum_ref[...] += jnp.sum(zm, axis=1, keepdims=True)
    psq_ref[...] += jnp.sum(zsq, axis=1, keepdims=True)


def bn_relu_kernel(z_ref, scale_ref, shift_ref, o_ref):
    """Folded BN + ReLU: out = max(z * scale + shift, 0).  z arrives in bf16."""
    z = z_ref[...].astype(jnp.float32)                # (C_out, t_tile)
    o_ref[...] = jnp.maximum(z * scale_ref[...] + shift_ref[...],
                             0.0).astype(o_ref.dtype)


def subblock_forward(x, dw_w, dw_b, pw_w, pw_b, gamma, beta, *, padding):
    """x: (N, C_in, T) f32 -> (N, C_out, T_out) f32 (PyTorch Conv1d layout).

    dw_b / pw_b are accepted for API fidelity; a per-channel constant added
    before train-mode BatchNorm cancels exactly through the mean subtraction,
    so the forward output does not depend on them.  (Eval-mode running-stat
    BN would need them added back.)
    """
    n, c_in, t = x.shape
    k_size = dw_w.shape[1]
    c_out = pw_w.shape[0]
    t_out = t + 2 * padding - k_size + 1

    budget = _vmem_budget_bytes()
    fir_bf16 = _fir_in_bf16()

    # Lane-dense time padding to a multiple of 512 (kernel 2 never drops below
    # a 512-wide tile); tail masked from stats and sliced off at the end.
    t_out_p = _round_up(t_out, 512)

    # ---- Kernel-1 T tile: largest divisor of t_out_p fitting the VMEM budget.
    def k1_est(tt):
        t_in_p = _round_up(tt + k_size - 1, 128)
        io = 2 * (c_in * t_in_p * 2 + c_out * tt * 2 + 2 * c_out * 4)
        fir = 3 * c_in * tt * (2 if fir_bf16 else 4) + c_in * tt * 4
        zf32 = 3 * c_out * tt * 4
        return io + fir + zf32 + (1 << 20)

    t_tile1 = 512
    for cand in (4096, 2048, 1024, 512):
        if t_out_p % cand == 0 and k1_est(cand) <= budget // 2:
            t_tile1 = cand
            break
    nt1 = t_out_p // t_tile1
    t_in_tile_p = _round_up(t_tile1 + k_size - 1, 128)

    # Halo'd (overlapping) input windows built once in plain JAX; one T tile is
    # just a reshape (no data duplication).
    t_in_needed = (nt1 - 1) * t_tile1 + t_in_tile_p
    x_bf16 = x.astype(jnp.bfloat16)               # halve HBM traffic into MXU
    x_pad = jnp.pad(x_bf16,
                    ((0, 0), (0, 0), (padding, t_in_needed - t - padding)))
    if nt1 == 1:
        x_tiles = x_pad[:, None, :, :]
    else:
        win = (jnp.arange(nt1, dtype=jnp.int32)[:, None] * t_tile1 +
               jnp.arange(t_in_tile_p, dtype=jnp.int32)[None, :])
        x_tiles = jnp.transpose(x_pad[:, :, win], (0, 2, 1, 3))
    # x_tiles: (N, nt1, C_in, t_in_tile_p) bf16

    pw_bf16 = pw_w.astype(jnp.bfloat16)
    dw_cast = dw_w.astype(jnp.bfloat16 if fir_bf16 else jnp.float32)

    kernel1 = functools.partial(conv_stats_kernel,
                                k_size=k_size, t_tile=t_tile1,
                                t_valid=t_out, t_padded=t_out_p,
                                fir_bf16=fir_bf16)
    z, psum, psq = pl.pallas_call(
        kernel1,
        grid=(n, nt1),
        in_specs=[
            pl.BlockSpec((None, None, c_in, t_in_tile_p),
                         lambda i, j: (i, j, 0, 0)),
            pl.BlockSpec((c_in, k_size), lambda i, j: (0, 0)),
            pl.BlockSpec((c_out, c_in), lambda i, j: (0, 0)),
        ],
        out_specs=[
            pl.BlockSpec((None, c_out, t_tile1), lambda i, j: (i, 0, j)),
            pl.BlockSpec((None, c_out, 1), lambda i, j: (i, 0, 0)),
            pl.BlockSpec((None, c_out, 1), lambda i, j: (i, 0, 0)),
        ],
        out_shape=(
            jax.ShapeDtypeStruct((n, c_out, t_out_p), jnp.bfloat16),
            jax.ShapeDtypeStruct((n, c_out, 1), jnp.float32),
            jax.ShapeDtypeStruct((n, c_out, 1), jnp.float32),
        ),
        compiler_params=pltpu.CompilerParams(
            # Batch axis parallel (feeds both v7x TensorCores; stats are
            # per-batch partials so no cross-core accumulator race); the T
            # axis carries the BN-stat accumulation.
            dimension_semantics=("parallel", "arbitrary"),
            vmem_limit_bytes=int(min(budget, max(16 << 20, k1_est(t_tile1)))),
        ),
    )(x_tiles, dw_cast, pw_bf16)

    # Tiny per-channel glue: reduce per-batch partials, fold train-mode BN
    # into a single FMA.
    # TODO(synk): E[z^2]-E[z]^2 in f32 can cancel for |mean| >> std at very
    # large N*T; switch to shifted/Kahan sums if BN stats must be bit-robust.
    count = float(n * t_out)
    ssum = jnp.sum(psum[:, :, 0], axis=0)
    ssq = jnp.sum(psq[:, :, 0], axis=0)
    mean = ssum / count
    var = jnp.maximum(ssq / count - mean * mean, 0.0)     # biased variance
    scale = gamma * jax.lax.rsqrt(var + BN_EPS)
    shift = beta - mean * scale
    scale2 = scale.reshape(c_out, 1).astype(jnp.float32)
    shift2 = shift.reshape(c_out, 1).astype(jnp.float32)

    # ---- Kernel 2: normalize + ReLU, tiled over (N, T), fully parallel.
    def k2_est(tt):
        return 2 * (c_out * tt * 2 + c_out * tt * 4) + c_out * tt * 4 + (1 << 20)

    t_tile2 = 512
    for cand in (4096, 2048, 1024, 512):
        if t_out_p % cand == 0 and k2_est(cand) <= budget // 2:
            t_tile2 = cand
            break

    out_p = pl.pallas_call(
        bn_relu_kernel,
        grid=(n, t_out_p // t_tile2),
        in_specs=[
            pl.BlockSpec((None, c_out, t_tile2), lambda i, j: (i, 0, j)),
            pl.BlockSpec((c_out, 1), lambda i, j: (0, 0)),
            pl.BlockSpec((c_out, 1), lambda i, j: (0, 0)),
        ],
        out_specs=pl.BlockSpec((None, c_out, t_tile2), lambda i, j: (i, 0, j)),
        out_shape=jax.ShapeDtypeStruct((n, c_out, t_out_p), jnp.float32),
        compiler_params=pltpu.CompilerParams(
            dimension_semantics=("parallel", "parallel"),
            vmem_limit_bytes=int(min(budget, max(16 << 20, k2_est(t_tile2)))),
        ),
    )(z, scale2, shift2)

    return out_p[:, :, :t_out]


def _reference(x, dw_w, dw_b, pw_w, pw_b, gamma, beta, *, padding):
    """Pure-JAX f32 reference matching the PyTorch SubBlock forward."""
    x_pad = jnp.pad(x, ((0, 0), (0, 0), (padding, padding)))
    k = dw_w.shape[1]
    t_out = x_pad.shape[2] - k + 1
    y = sum(x_pad[:, :, i:i + t_out] * dw_w[:, i][None, :, None]
            for i in range(k)) + dw_b[None, :, None]
    z = jnp.einsum("oc,nct->not", pw_w, y) + pw_b[None, :, None]
    mean = jnp.mean(z, axis=(0, 2), keepdims=True)
    var = jnp.mean((z - mean) ** 2, axis=(0, 2), keepdims=True)
    zh = (z - mean) * jax.lax.rsqrt(var + BN_EPS)
    return jnp.maximum(zh * gamma[None, :, None] + beta[None, :, None], 0.0)


if __name__ == "__main__":
    # Small shapes consistent with SubBlock(in_channels=4, out_channels=8,
    # kernel_size=3, padding=1) applied to x of shape (N=2, C_in=4, T=16).
    N, C_IN, C_OUT, T, K, PAD = 2, 4, 8, 16, 3, 1

    key = jax.random.PRNGKey(0)
    kx, k1, k2, k3, k4, k5, k6 = jax.random.split(key, 7)

    x = jax.random.normal(kx, (N, C_IN, T), dtype=jnp.float32)
    dw_w = 0.3 * jax.random.normal(k1, (C_IN, K), dtype=jnp.float32)
    dw_b = 0.1 * jax.random.normal(k2, (C_IN,), dtype=jnp.float32)
    pw_w = 0.3 * jax.random.normal(k3, (C_OUT, C_IN), dtype=jnp.float32)
    pw_b = 0.1 * jax.random.normal(k4, (C_OUT,), dtype=jnp.float32)
    gamma = 1.0 + 0.1 * jax.random.normal(k5, (C_OUT,), dtype=jnp.float32)
    beta = 0.1 * jax.random.normal(k6, (C_OUT,), dtype=jnp.float32)

    out = subblock_forward(x, dw_w, dw_b, pw_w, pw_b, gamma, beta, padding=PAD)
    out = jax.block_until_ready(out)
    assert out.shape == (N, C_OUT, T + 2 * PAD - K + 1)

    ref = jax.block_until_ready(
        _reference(x, dw_w, dw_b, pw_w, pw_b, gamma, beta, padding=PAD))
    max_err = float(jnp.max(jnp.abs(out - ref)))
    # Loose tolerance: x, depthwise taps, pointwise weights and the stored
    # intermediate z are all bf16 (stats accumulate in f32), and BN's 1/std
    # amplifies the rounding on this tiny batch.
    assert max_err < 0.2, f"max |err| vs f32 reference = {max_err}"
    print("KERNEL_OK")
</pallas_src>

<mosaic_0001>
module attributes {stable_mosaic.version = 11 : i64} {
  func.func @conv_stats_kernel(%arg0: i32, %arg1: i32, %arg2: memref<1x1x4x640xbf16, #tpu.memory_space<vmem>>, %arg3: memref<4x3xbf16, #tpu.memory_space<vmem>>, %arg4: memref<8x4xbf16, #tpu.memory_space<vmem>>, %arg5: memref<1x8x512xbf16, #tpu.memory_space<vmem>>, %arg6: memref<1x8x1xf32, #tpu.memory_space<vmem>>, %arg7: memref<1x8x1xf32, #tpu.memory_space<vmem>>) attributes {dimension_semantics = [#tpu.dimension_semantics<parallel>, #tpu.dimension_semantics<arbitrary>], iteration_bounds = array<i64: 2, 1>, scalar_prefetch = 0 : i64, scratch_operands = 0 : i64, tpu.core_type = #tpu.core_type<tc>, window_params = [{transform_indices = @transform_0, window_bounds = array<i64: 1, 1, 4, 640>}, {pipeline_mode = #tpu.pipeline_mode<synchronous>, transform_indices = @transform_1, window_bounds = array<i64: 4, 3>}, {pipeline_mode = #tpu.pipeline_mode<synchronous>, transform_indices = @transform_2, window_bounds = array<i64: 8, 4>}, {transform_indices = @transform_3, window_bounds = array<i64: 1, 8, 512>}, {transform_indices = @transform_4, window_bounds = array<i64: 1, 8, 1>}, {transform_indices = @transform_5, window_bounds = array<i64: 1, 8, 1>}]} {
    %c0 = arith.constant 0 : index
    %c0_0 = arith.constant 0 : index
    %c0_1 = arith.constant 0 : index
    %c0_2 = arith.constant 0 : index
    %0 = vector.load %arg2[%c0, %c0_0, %c0_1, %c0_2] : memref<1x1x4x640xbf16, #tpu.memory_space<vmem>>, vector<1x1x4x640xbf16>
    %1 = vector.shape_cast %0 : vector<1x1x4x640xbf16> to vector<4x640xbf16>
    %c0_3 = arith.constant 0 : index
    %c0_4 = arith.constant 0 : index
    %2 = vector.load %arg3[%c0_3, %c0_4] : memref<4x3xbf16, #tpu.memory_space<vmem>>, vector<4x3xbf16>
    %3 = vector.extract_strided_slice %1 {offsets = [0, 0], sizes = [4, 512], strides = [1, 1]} : vector<4x640xbf16> to vector<4x512xbf16>
    %4 = vector.extract_strided_slice %2 {offsets = [0, 0], sizes = [4, 1], strides = [1, 1]} : vector<4x3xbf16> to vector<4x1xbf16>
    %5 = vector.broadcast %4 : vector<4x1xbf16> to vector<4x512xbf16>
    %6 = arith.mulf %3, %5 : vector<4x512xbf16>
    %7 = arith.extf %6 : vector<4x512xbf16> to vector<4x512xf32>
    %8 = vector.extract_strided_slice %1 {offsets = [0, 1], sizes = [4, 512], strides = [1, 1]} : vector<4x640xbf16> to vector<4x512xbf16>
    %9 = vector.extract_strided_slice %2 {offsets = [0, 1], sizes = [4, 1], strides = [1, 1]} : vector<4x3xbf16> to vector<4x1xbf16>
    %10 = vector.broadcast %9 : vector<4x1xbf16> to vector<4x512xbf16>
    %11 = arith.mulf %8, %10 : vector<4x512xbf16>
    %12 = arith.extf %11 : vector<4x512xbf16> to vector<4x512xf32>
    %13 = arith.addf %7, %12 : vector<4x512xf32>
    %14 = vector.extract_strided_slice %1 {offsets = [0, 2], sizes = [4, 512], strides = [1, 1]} : vector<4x640xbf16> to vector<4x512xbf16>
    %15 = vector.extract_strided_slice %2 {offsets = [0, 2], sizes = [4, 1], strides = [1, 1]} : vector<4x3xbf16> to vector<4x1xbf16>
    %16 = vector.broadcast %15 : vector<4x1xbf16> to vector<4x512xbf16>
    %17 = arith.mulf %14, %16 : vector<4x512xbf16>
    %18 = arith.extf %17 : vector<4x512xbf16> to vector<4x512xf32>
    %19 = arith.addf %13, %18 : vector<4x512xf32>
    %c0_5 = arith.constant 0 : index
    %c0_6 = arith.constant 0 : index
    %20 = vector.load %arg4[%c0_5, %c0_6] : memref<8x4xbf16, #tpu.memory_space<vmem>>, vector<8x4xbf16>
    %21 = arith.truncf %19 : vector<4x512xf32> to vector<4x512xbf16>
    %cst = arith.constant dense<0.000000e+00> : vector<8x512xf32>
    %22 = tpu.matmul %20, %21, %cst {dimension_numbers = #tpu.dot_dimension_numbers<[1], [0], [0], [1], [0, 0, 1, 1], [], []>} : vector<8x4xbf16>, vector<4x512xbf16>, vector<8x512xf32> -> vector<8x512xf32>
    %23 = arith.truncf %22 : vector<8x512xf32> to vector<8x512xbf16>
    %c0_7 = arith.constant 0 : index
    %c0_8 = arith.constant 0 : index
    %c0_9 = arith.constant 0 : index
    %24 = vector.load %arg5[%c0_7, %c0_8, %c0_9] : memref<1x8x512xbf16, #tpu.memory_space<vmem>>, vector<1x8x512xbf16>
    %25 = vector.shape_cast %24 : vector<1x8x512xbf16> to vector<8x512xbf16>
    %26 = vector.shape_cast %23 : vector<8x512xbf16> to vector<1x8x512xbf16>
    tpu.vector_store %arg5[%c0_7, %c0_8, %c0_9], %26 {strides = array<i32>} : memref<1x8x512xbf16, #tpu.memory_space<vmem>>, vector<1x8x512xbf16>,
    %27 = tpu.iota {dimensions = array<i32: 1>} : vector<8x512xi32>
    %c512_i32 = arith.constant 512 : i32
    %28 = arith.muli %arg1, %c512_i32 : i32
    %29 = vector.broadcast %28 : i32 to vector<8x512xi32>
    %30 = arith.addi %27, %29 : vector<8x512xi32>
    %c16_i32 = arith.constant 16 : i32
    %31 = vector.broadcast %c16_i32 : i32 to vector<8x512xi32>
    %32 = arith.cmpi slt, %30, %31 : vector<8x512xi32>
    %cst_10 = arith.constant 0.000000e+00 : f32
    %33 = vector.broadcast %cst_10 : f32 to vector<8x512xf32>
    %34 = arith.select %32, %22, %33 : vector<8x512xi1>, vector<8x512xf32>
    %35 = arith.mulf %22, %22 : vector<8x512xf32>
    %cst_11 = arith.constant 0.000000e+00 : f32
    %36 = vector.broadcast %cst_11 : f32 to vector<8x512xf32>
    %37 = arith.select %32, %35, %36 : vector<8x512xi1>, vector<8x512xf32>
    %c0_i32 = arith.constant 0 : i32
    %38 = arith.cmpi eq, %arg1, %c0_i32 : i32
    %39 = arith.extui %38 : i1 to i32
    %c0_i32_12 = arith.constant 0 : i32
    %40 = arith.cmpi ne, %39, %c0_i32_12 : i32
    scf.if %40 {
      %cst_27 = arith.constant 0.000000e+00 : f32
      %57 = vector.broadcast %cst_27 : f32 to vector<8x1xf32>
      %c0_28 = arith.constant 0 : index
      %c0_29 = arith.constant 0 : index
      %c0_30 = arith.constant 0 : index
      %58 = vector.load %arg6[%c0_28, %c0_29, %c0_30] : memref<1x8x1xf32, #tpu.memory_space<vmem>>, vector<1x8x1xf32>
      %59 = vector.shape_cast %58 : vector<1x8x1xf32> to vector<8x1xf32>
      %60 = vector.shape_cast %57 : vector<8x1xf32> to vector<1x8x1xf32>
      tpu.vector_store %arg6[%c0_28, %c0_29, %c0_30], %60 {strides = array<i32>} : memref<1x8x1xf32, #tpu.memory_space<vmem>>, vector<1x8x1xf32>,
      %cst_31 = arith.constant 0.000000e+00 : f32
      %61 = vector.broadcast %cst_31 : f32 to vector<8x1xf32>
      %c0_32 = arith.constant 0 : index
      %c0_33 = arith.constant 0 : index
      %c0_34 = arith.constant 0 : index
      %62 = vector.load %arg7[%c0_32, %c0_33, %c0_34] : memref<1x8x1xf32, #tpu.memory_space<vmem>>, vector<1x8x1xf32>
      %63 = vector.shape_cast %62 : vector<1x8x1xf32> to vector<8x1xf32>
      %64 = vector.shape_cast %61 : vector<8x1xf32> to vector<1x8x1xf32>
      tpu.vector_store %arg7[%c0_32, %c0_33, %c0_34], %64 {strides = array<i32>} : memref<1x8x1xf32, #tpu.memory_space<vmem>>, vector<1x8x1xf32>,
    } else {
    }
    %c0_13 = arith.constant 0 : index
    %c0_14 = arith.constant 0 : index
    %c0_15 = arith.constant 0 : index
    %41 = vector.load %arg6[%c0_13, %c0_14, %c0_15] : memref<1x8x1xf32, #tpu.memory_space<vmem>>, vector<1x8x1xf32>
    %42 = vector.shape_cast %41 : vector<1x8x1xf32> to vector<8x1xf32>
    %cst_16 = arith.constant dense<0.000000e+00> : vector<8xf32>
    %43 = vector.multi_reduction <add>, %34, %cst_16 [1] : vector<8x512xf32> to vector<8xf32>
    %44 = vector.shape_cast %43 : vector<8xf32> to vector<8x1xf32>
    %45 = arith.addf %42, %44 : vector<8x1xf32>
    %c0_17 = arith.constant 0 : index
    %c0_18 = arith.constant 0 : index
    %c0_19 = arith.constant 0 : index
    %46 = vector.load %arg6[%c0_17, %c0_18, %c0_19] : memref<1x8x1xf32, #tpu.memory_space<vmem>>, vector<1x8x1xf32>
    %47 = vector.shape_cast %46 : vector<1x8x1xf32> to vector<8x1xf32>
    %48 = vector.shape_cast %45 : vector<8x1xf32> to vector<1x8x1xf32>
    tpu.vector_store %arg6[%c0_17, %c0_18, %c0_19], %48 {strides = array<i32>} : memref<1x8x1xf32, #tpu.memory_space<vmem>>, vector<1x8x1xf32>,
    %c0_20 = arith.constant 0 : index
    %c0_21 = arith.constant 0 : index
    %c0_22 = arith.constant 0 : index
    %49 = vector.load %arg7[%c0_20, %c0_21, %c0_22] : memref<1x8x1xf32, #tpu.memory_space<vmem>>, vector<1x8x1xf32>
    %50 = vector.shape_cast %49 : vector<1x8x1xf32> to vector<8x1xf32>
    %cst_23 = arith.constant dense<0.000000e+00> : vector<8xf32>
    %51 = vector.multi_reduction <add>, %37, %cst_23 [1] : vector<8x512xf32> to vector<8xf32>
    %52 = vector.shape_cast %51 : vector<8xf32> to vector<8x1xf32>
    %53 = arith.addf %50, %52 : vector<8x1xf32>
    %c0_24 = arith.constant 0 : index
    %c0_25 = arith.constant 0 : index
    %c0_26 = arith.constant 0 : index
    %54 = vector.load %arg7[%c0_24, %c0_25, %c0_26] : memref<1x8x1xf32, #tpu.memory_space<vmem>>, vector<1x8x1xf32>
    %55 = vector.shape_cast %54 : vector<1x8x1xf32> to vector<8x1xf32>
    %56 = vector.shape_cast %53 : vector<8x1xf32> to vector<1x8x1xf32>
    tpu.vector_store %arg7[%c0_24, %c0_25, %c0_26], %56 {strides = array<i32>} : memref<1x8x1xf32, #tpu.memory_space<vmem>>, vector<1x8x1xf32>,
    return
  }
  func.func @transform_0(%arg0: i32, %arg1: i32) -> (i32, i32, i32, i32) {
    %c0_i32 = arith.constant 0 : i32
    %c0_i32_0 = arith.constant 0 : i32
    %c0_i32_1 = arith.constant 0 : i32
    return %arg0, %arg1, %c0_i32, %c0_i32_0 : i32, i32, i32, i32
  }
  func.func @transform_1(%arg0: i32, %arg1: i32) -> (i32, i32) {
    %c0_i32 = arith.constant 0 : i32
    %c0_i32_0 = arith.constant 0 : i32
    %c0_i32_1 = arith.constant 0 : i32
    return %c0_i32, %c0_i32_0 : i32, i32
  }
  func.func @transform_2(%arg0: i32, %arg1: i32) -> (i32, i32) {
    %c0_i32 = arith.constant 0 : i32
    %c0_i32_0 = arith.constant 0 : i32
    %c0_i32_1 = arith.constant 0 : i32
    return %c0_i32, %c0_i32_0 : i32, i32
  }
  func.func @transform_3(%arg0: i32, %arg1: i32) -> (i32, i32, i32) {
    %c0_i32 = arith.constant 0 : i32
    %c0_i32_0 = arith.constant 0 : i32
    return %arg0, %c0_i32, %arg1 : i32, i32, i32
  }
  func.func @transform_4(%arg0: i32, %arg1: i32) -> (i32, i32, i32) {
    %c0_i32 = arith.constant 0 : i32
    %c0_i32_0 = arith.constant 0 : i32
    %c0_i32_1 = arith.constant 0 : i32
    return %arg0, %c0_i32, %c0_i32_0 : i32, i32, i32
  }
  func.func @transform_5(%arg0: i32, %arg1: i32) -> (i32, i32, i32) {
    %c0_i32 = arith.constant 0 : i32
    %c0_i32_0 = arith.constant 0 : i32
    %c0_i32_1 = arith.constant 0 : i32
    return %arg0, %c0_i32, %c0_i32_0 : i32, i32, i32
  }
}

</mosaic_0001>

<bundles_post_ra>
// kernel: tpu_custom_call.1
= control target key start
LH: loop header
LB: loop body
LE: loop exit
PB: predicated region body
PF: predicated region fallthrough
CT: control target
= control target key end

     0   :  { %11 = vsyncpa [#allocation3], 0  ;;  %s1177_s0 = inlined_call_operand.hbm [shape: bf16[2,1,4,640], index: 0, kind: input, shape index: {}]   ;;  %s1178_s1 = inlined_call_operand.vmem [shape: bf16[4,3], index: 1, kind: input, shape index: {}]   ;;  %s1179_s2 = inlined_call_operand.vmem [shape: bf16[8,4], index: 2, kind: input, shape index: {}]   ;;  %s1180_s3 = inlined_call_operand.hbm [shape: bf16[2,8,512], index: 3, kind: output, shape index: {0}]   ;;  %s1181_s4 = inlined_call_operand.vmem [shape: f32[2,8,1], index: 4, kind: output, shape index: {1}]   ;;  %s1182_s5 = inlined_call_operand.vmem [shape: f32[2,8,1], index: 5, kind: output, shape index: {2}]  }
   0x1   :  { %13 = vsyncpa [#allocation3 + $0x1], 0 }
   0x2   :  { %14 = vsyncpa [#allocation4], 0 }
   0x3   :  { %16 = vsyncpa [#allocation4 + $0x1], 0  ;;  %s978_s18 = smov 0   ;;  %s980_s19 = smov 0  }
   0x4   :  { %s982_s20 = smov 0   ;;  %s984_s21 = smov 0  }
   0x5   :  { %s986_s22 = smov 0   ;;  %s988_s23 = smov 0  }
   0x6 LB: > { %s717_s24 = sadd.s32 4294967295, %s937_s23   ;;  %s718_s25 = sadd.s32 4294967294, %s937_s23   ;;  %s937_s23 = sphi %s988_s23, %s22_s23   ;;  %s933_s22 = sphi %s986_s22, %s1197_s22   ;;  %s929_s21 = sphi %s984_s21, %s1196_s21   ;;  %s925_s20 = sphi %s982_s20, %s1195_s20   ;;  %s921_s19 = sphi %s980_s19, %s1194_s19   ;;  %s917_s18 = sphi %s978_s18, %s1193_s18  }
   0x7   : > { %s34_s26 = sadd.s32 1, %s933_s22  ;;  %s43_s27 = sadd.s32 1, %s925_s20 }
   0x8   : > { %p36_p0 = scmp.ge.s32.totalorder %s34_s26, 2  ;;  %p50_p1 = scmp.ne.s32.totalorder %s925_s20, %s921_s19 }
   0x9   : > { %p51_p2 = scmp.eq.s32.totalorder %s937_s23, 0  ;;  %p56_p3 = scmp.ne.s32.totalorder %s921_s19, %s917_s18 }
   0xa   : > { %s1199_s26 = smov (%p36_p0, %s34_s26), 0  ;;  %p57_p5 = scmp.eq.s32.totalorder %s717_s24, 0 }
   0xb   : > { %p1019_p4 = por %p51_p2, %p50_p1  ;;  %s38_s29 = ssub.s32 %s933_s22, %s1199_s26 }
   0xc   : > { %p124_p6 = scmp.eq.s32.totalorder %s717_s24, 1  ;;  %p41_p7 = scmp.eq.s32.totalorder %s38_s29, 0 }
   0xd   : > { %p1025_p8 = por %p57_p5, %p56_p3  ;;  %p130_p10 = scmp.eq.s32.totalorder %s718_s25, 1 }
   0xe   : > { %p1029_p9 = por %p124_p6, %p50_p1  ;;  %p755_p13 = scmp.lt.s32.totalorder %s937_s23, 2 }
   0xf   : > { %s1034_s7 = scalar_select %p41_p7, %s925_s20, %s43_s27  }
  0x10   : > { %s1186_s6 = scalar_select %p1029_p9, 1, 0 }
  0x11   : > { %p1036_p11 = por %p130_p10, %p56_p3  ;;  %s208_s9 = sand.u32 1, %s925_s20  }
  0x12   : > { %s740_s10 = smul.u32 10, %s208_s9  ;;  %p1046_p0 = pnand %p755_p13, %p1019_p4 }
  0x13   : > { %s1187_s8 = scalar_select %p1036_p11, 1, 0 }
  0x14   : > { %s741_s11 = smul.u32 160, %s933_s22  ;;  %s212_s16 = scalar_lea.vmem [#allocation2], %s740_s10 }
  0x15   : > { %s222_s17 = sshll.u32 %s212_s16, 4  ;;  %s209_s24 = scalar_lea.sflag [#allocation3], %s208_s9  ;;  %s1056_s17 = int_to_ptr.vmem [resolvable:$true] %s222_s17 }
  0x16   : > { %s1054_s15 = scalar_lea.hbm %s1177_s0, %s741_s11  ;;  %p827_p3 = pneg %p1046_p0 }
  0x17   : > { %s825_s25 = scalar_lea.hbm %s1054_s15, 160  ;;  %s830_s29 = scalar_lea.hbm %s1177_s0, 320 }
  0x18   : > { %p826_p2 = scmp.ne.s32.totalorder %s1054_s15, %s825_s25  ;;  %p831_p6 = scmp.lt.u32.totalorder %s1054_s15, %s1177_s0 }
  0x19   : > { %p832_p7 = scmp.lt.u32.totalorder %s830_s29, %s825_s25  ;;  %p834_p13 = scmp.lt.u32.totalorder %s825_s25, %s1054_s15 }
  0x1a   : > { %p828_p4 = pnand %p827_p3, %p826_p2 }
  0x1b   : > { %p833_p10 = por %p832_p7, %p831_p6 }
  0x1c   : > { %p829_p5 = pneg %p828_p4 }
  0x1d   : > { %p835_p12 = por %p834_p13, %p833_p10 }
  0x1f   : > { %p836_p1 = pnand %p835_p12, %p829_p5 }
  0x21   : > { %839 = shalt.err (!%p836_p1)
}
  0x22   : > { %s840_s9 = scalar_lea.vmem %s1056_s17, 160  ;;  %s939_s10 = smov [#allocation2]  }
  0x23   : > { %p841_p2 = scmp.ne.s32.totalorder %s1056_s17, %s840_s9  ;;  %s845_s14 = sshll.u32 %s939_s10, 4  ;;  %s846_s14 = int_to_ptr.vmem [resolvable:$false] %s845_s14 }
  0x24   : > { %s847_s16 = scalar_lea.vmem %s846_s14, 320  ;;  %p848_p9 = scmp.lt.s32.totalorder %s1056_s17, %s846_s14 }
  0x25   : > { %p843_p4 = pnand %p841_p2, %p827_p3  ;;  %p849_p6 = scmp.lt.s32.totalorder %s847_s16, %s840_s9 }
  0x27   : > { %p844_p11 = pneg %p843_p4  ;;  %p850_p7 = por %p849_p6, %p848_p9 }
  0x29   : > { %p851_p10 = pnand %p850_p7, %p844_p11 }
  0x2b   : > { %854 = shalt.err (!%p851_p10)
}
  0x2c   : > { %750 = dma.hbm_to_vmem [thread:$0]  (!%p1046_p0), %s1054_s15, 160, %s1056_s17, %s209_s24  }
  0x2d   : > { %p227_p12 = scmp.lt.s32.totalorder %s937_s23, 3  ;;  %p1189_p1 = scmp.ge.s32.totalorder %s937_s23, 1 }
  0x2f   : > { %p228_p3 = pnand %p1189_p1, %p227_p12 }
  0x30   : > { %s1087_s25 = sand.u32 (!%p228_p3), 1, %s921_s19  }
  0x31   : > { %231 = sbr.rel (%p228_p3) target bundleno = 692 (0x2b4), region = 32  ;;  %s234_s28 = scalar_lea.sflag (!%p228_p3), [#allocation3], %s1087_s25 }
  0x32   : > { %s742_s27 = smul.u32 (!%p228_p3), 10, %s1087_s25 }
  0x34   : > { %s237_s29 = scalar_lea.vmem (!%p228_p3), [#allocation2], %s742_s27 }
  0x38   : > { %908 = dma.done.wait (%p1025_p8), %s234_s28, 160  }
  0x39   : > { %910 = vsyncadd (%p1025_p8), %s234_s28, 4294967136  ;;  %v940_v0 = vmov 1   ;;  %v941_v1 = vmov 0   ;;  %v284_v2 = vld [vmem:[%s1178_s1] sm:$0x3]  ;;  %v942_v3 = vmov 2   ;;  %v293_v6 = vlaneseq }
  0x3a   : > { %812 = vset.pattern.permute.xlu0 %v940_v0  ;;  %814 = vset.pattern.permute.xlu1 %v941_v1  ;;  %v943_v4 = vmov 269488144   ;;  %v282_v11 = vld [vmem:[%s237_s29] sm:$0xff]  ;;  %v283_v12 = vld [vmem:[%s237_s29 + $0x8] sm:$0x3]  ;;  %s944_s30 = smov 127  }
  0x3b   : > { %435 = vmatprep.mubr.bf16.mxu0 %v941_v1  ;;  %476 = vmatprep.mubr.bf16.mxu1 %v941_v1  ;;  %v291_v5 = vunpack.c.l.s4 %v943_v4  ;;  %v294_v8 = vshrl.u32 %v293_v6, 7  ;;  %s945_s17 = smov 126   ;;  %vm328_vm0 = vcmask 1043456   ;;  %vm330_vm1 = vcmask 1039360   ;;  %p273_p8 = scmp.lt.s32.totalorder %s929_s21, 1 }
  0x3c   : > { %301 = vperm.xlu0 %812, %v284_v2   ;;  %287 = vperm.xlu1 %814, %v284_v2   ;;  %vm367_vm2 = vcmask 1031168   ;;  %vm390_vm3 = vcmask 1041408   ;;  %vm386_vm4 = vcmask 31744   ;;  %vm534_vm5 = vcmask 7168   ;;  %s723_s27 = sshll.u32 %s1087_s25, 4  ;;  %s555_s10 = scalar_lea.sflag [#allocation4], %s1087_s25 }
  0x3d   : > { %v292_v7 = vunpack.c.0.s8 %v291_v5  ;;  %s274_s13 = scalar_select %p273_p8, %s929_s21, 1  ;;  %v946_v4 = vmov 0.0   ;;  %v504_v5 = vand.u32 127, %v293_v6 }
  0x3e   : > { %s259_s28 = scalar_lea.vmem [#allocation5], %s723_s27  ;;  %p1190_p11 = scmp.ne.s32.totalorder %s1186_s6, 0 }
  0x3f   : > { %v295_v9 = vsub.s32 %v292_v7, %v294_v8  ;;  %s724_s9 = sshll.u32 %s274_s13, 3  ;;  %vm514_vm6 = vcmp.lt.s32.totalorder %v504_v5, 16  ;;  %s947_s27 = smov [#allocation5]  }
  0x40   : > { %813 = vset.pattern.permute.xlu0 %v942_v3  ;;  %s1111_s16 = scalar_lea.vmem %s1181_s4, %s724_s9  ;;  %s1120_s15 = scalar_lea.vmem %s1182_s5, %s724_s9 }
  0x41   : > { %339 = vperm.xlu0 %813, %v284_v2   ;;  %v375_v2 = vld [vmem:[%s1179_s2] sm:$0xf]  ;;  %535 = vst.msk [vmem:[%s1111_s16] sm:$0xff] %vm534_vm5, %v946_v4  ;;  %536 = vst.msk [vmem:[%s1120_s15] sm:$0xff] %vm534_vm5, %v946_v4  ;;  %s859_s9 = sshll.u32 %s947_s27, 4  ;;  %s860_s9 = int_to_ptr.vmem [resolvable:$false] %s859_s9 }
  0x42   : > { %s861_s29 = scalar_lea.vmem %s860_s9, 512 }
  0xbb   : > { %v302_v10 = vpop.permute.xlu0 %301  ;;  %v288_v13 = vpop.permute.xlu1 %287 }
  0xbc   : > { %v310_v14 = vrot.slane %v302_v10, %v295_v9  ;;  %v296_v15 = vrot.slane %v288_v13, %v295_v9 }
  0xbe   : > { %v311_v16 = vmul.bf16 %v310_v14, %v282_v11  ;;  %v312_v17 = vmul.bf16 %v310_v14, %v283_v12  ;;  %v297_v18 = vmul.bf16 %v296_v15, %v282_v11 }
  0xc0   : > { %v313_v19 = vunpack.c.l.bf16 %v311_v16  ;;  %v314_v20 = vunpack.c.h.bf16 %v311_v16  ;;  %v315_v21 = vunpack.c.l.bf16 %v312_v17  ;;  %v340_v22 = vpop.permute.xlu0 %339  ;;  %v298_v44 = vunpack.c.l.bf16 %v297_v18 }
  0xc1   : > { %v348_v23 = vrot.slane %v340_v22, %v295_v9  ;;  %v299_v49 = vunpack.c.h.bf16 %v297_v18 }
  0xc2   : > { %323 = vrot.lane.b32.xlu0 %v315_v21, %s944_s30  ;;  %v815_v24 = vpack.i.bf16 %v314_v20, %v313_v19 }
  0xc3   : > { %v349_v25 = vmul.bf16 %v348_v23, %v282_v11  ;;  %v350_v28 = vmul.bf16 %v348_v23, %v283_v12 }
  0xc4   : > { %816 = vrot.lane.b32.xlu1 %v815_v24, %s944_s30  ;;  %s739_s30 = sshll.u32 %s929_s21, 8 }
  0xc5   : > { %v351_v26 = vunpack.c.l.bf16 %v349_v25  ;;  %v352_v27 = vunpack.c.h.bf16 %v349_v25  ;;  %v353_v30 = vunpack.c.l.bf16 %v350_v28  ;;  %s1128_s13 = scalar_lea.hbm %s1180_s3, %s739_s30 }
  0xc7   : > { %v820_v29 = vpack.i.bf16 %v352_v27, %v351_v26 }
  0xc9   : > { %821 = vrot.lane.b32.xlu1 %v820_v29, %s945_s17 }
  0xcd   : > { %361 = vrot.lane.b32.xlu1 %v353_v30, %s945_s17  ;;  %s579_s17 = sshll.u32 %s259_s28, 4  ;;  %s580_s17 = int_to_ptr.vmem [resolvable:$true] %s579_s17 }
  0xce   : > { %s855_s14 = scalar_lea.vmem %s580_s17, 256  ;;  %p862_p13 = scmp.lt.s32.totalorder %s580_s17, %s860_s9 }
  0xcf   : > { %p856_p9 = scmp.ne.s32.totalorder %s580_s17, %s855_s14  ;;  %p863_p2 = scmp.lt.s32.totalorder %s861_s29, %s855_s14 }
  0xd1   : > { %p857_p0 = pnand %p856_p9, %p1190_p11  ;;  %p864_p4 = por %p863_p2, %p862_p13 }
  0xd3   : > { %p858_p5 = pneg %p857_p0 }
  0xd5   : > { %p865_p6 = pnand %p864_p4, %p858_p5 }
 0x134   : > { %v324_v32 = vpop.permute.xlu0 %323 }
 0x135   : > { %v327_v37 = vrot.slane %v324_v32, 4 }
 0x136   : > { %v817_v31 = vpop.permute.xlu1 %816 }
 0x137   : > { %v819_v33 = vunpack.i.h.bf16 %v817_v31  ;;  %v818_v34 = vunpack.i.l.bf16 %v817_v31 }
 0x139   : > { %v326_v35 = vrot.slane %v819_v33, 4  ;;  %v325_v36 = vrot.slane %v818_v34, 4 }
 0x13b   : > { %v329_v38 = vsel %vm328_vm0, %v325_v36, %v326_v35  ;;  %v822_v39 = vpop.permute.xlu1 %821  ;;  %v332_v40 = vsel %vm328_vm0, %v326_v35, %v327_v37 }
 0x13c   : > { %v824_v41 = vunpack.i.h.bf16 %v822_v39  ;;  %v823_v42 = vunpack.i.l.bf16 %v822_v39  ;;  %v331_v43 = vsel %vm330_vm1, %v818_v34, %v329_v38  ;;  %v333_v47 = vsel %vm330_vm1, %v819_v33, %v332_v40 }
 0x13d   : > { %v336_v51 = vadd.f32 %v331_v43, %v298_v44  ;;  %v337_v56 = vadd.f32 %v333_v47, %v299_v49 }
 0x13e   : > { %v364_v45 = vrot.slane %v824_v41, 4  ;;  %v363_v46 = vrot.slane %v823_v42, 4 }
 0x13f   : > { %v362_v48 = vpop.permute.xlu1 %361 }
 0x140   : > { %v365_v50 = vrot.slane %v362_v48, 4  ;;  %v366_v52 = vsel %vm328_vm0, %v363_v46, %v364_v45 }
 0x141   : > { %v368_v53 = vsel %vm367_vm2, %v823_v42, %v366_v52 }
 0x142   : > { %v369_v54 = vsel %vm328_vm0, %v364_v45, %v365_v50  ;;  %v373_v55 = vadd.f32 %v368_v53, %v336_v51 }
 0x143   : > { %v370_v57 = vsel %vm367_vm2, %v824_v41, %v369_v54 }
 0x144   : > { %v378_v58 = vcombine.high %v373_v55, %v373_v55  ;;  %v382_v59 = vpack.c.bf16 %v373_v55, %v373_v55  ;;  %v374_v60 = vadd.f32 %v370_v57, %v337_v56 }
 0x146   : > { %v383_v61 = vpack.c.bf16 %v378_v58, %v378_v58  ;;  %v379_v62 = vcombine.high %v374_v60, %v374_v60  ;;  %v384_v63 = vpack.c.bf16 %v374_v60, %v374_v60  ;;  %v392_v0 = vsel %vm390_vm3, %v382_v59, 0 }
 0x148   : > { %726 = vmatprep.subr.msk.bf16.mxu0 %vm390_vm3, %v383_v61  ;;  %v385_v1 = vpack.c.bf16 %v379_v62, %v379_v62  ;;  %v398_v3 = vsel %vm390_vm3, %v384_v63, 0 }
 0x149   : > { %404 = vmatpush1.bf16.msra.mxu0 %v392_v0 }
 0x14a   : > { %728 = vmatprep.subr.msk.bf16.mxu1 %vm390_vm3, %v385_v1 }
 0x14b   : > { %445 = vmatpush1.bf16.msra.mxu1 %v398_v3 }
 0x14c   : > { %727 = vmatmul.mubr.msk.bf16.vlgmr.msra.gmra.mrb[0].mxu0 %vm386_vm4, %v375_v2 }
 0x14e   : > { %729 = vmatmul.mubr.msk.bf16.vlgmr.msra.gmra.mrb[0].mxu1 %vm386_vm4, %v375_v2 }
 0x21f   : > { %v437_v7 = vpop.f32.mrb[0].mxu0 }
 0x220   : > { %v439_v8 = vpop.f32.mrb[1].mxu0  ;;  %v518_v9 = vsel %vm514_vm6, %v437_v7, 0.0  ;;  %v522_v10 = vmul.f32 %v437_v7, %v437_v7 }
 0x221   : > { %v737_v11 = vpack.c.bf16 %v439_v8, %v437_v7  ;;  %541 = vadd.xlane.f32.xlu0 %v518_v9  ;;  %v441_v12 = vpop.f32.mrb[2].mxu0  ;;  %v478_v13 = vpop.f32.mrb[0].mxu1 }
 0x222   : > { %v442_v14 = vpop.f32.mrb[3].mxu0  ;;  %v526_v15 = vsel %vm514_vm6, %v522_v10, 0.0  ;;  %v480_v16 = vpop.f32.mrb[1].mxu1 }
 0x223   : > { %501 = vst [vmem:[%s259_s28] sm:$0xff] %v737_v11  ;;  %550 = vadd.xlane.f32.xlu1 %v526_v15  ;;  %v738_v6 = vpack.c.bf16 %v480_v16, %v478_v13  ;;  %v482_v17 = vpop.f32.mrb[2].mxu1 }
 0x224   : > { %v483_v18 = vpop.f32.mrb[3].mxu1 }
 0x225   : > { %502 = vst [vmem:[%s259_s28 + $0x8] sm:$0xff] %v738_v6 }
 0x226   : > { %868 = shalt.err (!%p865_p6)
}
 0x227   : > { %s869_s21 = scalar_lea.hbm %s1128_s13, 256  ;;  %s873_s12 = scalar_lea.hbm %s1180_s3, 512 }
 0x228   : > { %p870_p7 = scmp.ne.s32.totalorder %s1128_s13, %s869_s21  ;;  %p874_p1 = scmp.lt.u32.totalorder %s1128_s13, %s1180_s3 }
 0x229   : > { %p875_p3 = scmp.lt.u32.totalorder %s873_s12, %s869_s21  ;;  %p877_p9 = scmp.lt.u32.totalorder %s869_s21, %s1128_s13 }
 0x22a   : > { %p871_p10 = pnand %p870_p7, %p1190_p11 }
 0x22b   : > { %p876_p8 = por %p875_p3, %p874_p1 }
 0x22c   : > { %p872_p12 = pneg %p871_p10 }
 0x22d   : > { %p878_p0 = por %p877_p9, %p876_p8 }
 0x22f   : > { %p879_p5 = pnand %p878_p0, %p872_p12 }
 0x231   : > { %882 = shalt.err (!%p879_p5)
}
 0x232   : > { %745 = dma.vmem_to_hbm [thread:$0]  (%p1190_p11), %s580_s17, 256, %s1128_s13, %s555_s10   ;;  %v537_v19 = vld [vmem:[%s1111_s16] sm:$0xff] }
 0x233   : > { %v546_v21 = vld [vmem:[%s1120_s15] sm:$0xff] }
 0x2ae   : > { %v542_v20 = vpop.xlane.xlu0 %541 }
 0x2af   : > { %v543_v22 = vadd.f32 %v542_v20, %v537_v19 }
 0x2b0   : > { %v551_v23 = vpop.xlane.xlu1 %550 }
 0x2b1   : > { %545 = vst.msk [vmem:[%s1111_s16] sm:$0xff] %vm534_vm5, %v543_v22  ;;  %v552_v24 = vadd.f32 %v551_v23, %v546_v21 }
 0x2b3   : > { %553 = vst.msk [vmem:[%s1120_s15] sm:$0xff] %vm534_vm5, %v552_v24 }
 0x2b4 PF: > { %s597_s6 = sand.u32 1, %s917_s18   ;;  %p1191_p13 = scmp.ne.s32.totalorder %s1187_s8, 0 }
 0x2b5   : > { %p1192_p2 = scmp.ge.s32.totalorder %s937_s23, 2  ;;  %s598_s11 = scalar_lea.sflag [#allocation4], %s597_s6 }
 0x2b7   : > { %p752_p4 = pnand %p1192_p2, %p1191_p13 }
 0x2b9   : > { %912 = dma.done.wait (!%p752_p4), %s598_s11, 256  }
 0x2ba   : > { %914 = vsyncadd (!%p752_p4), %s598_s11, 4294967040  ;;  %s22_s23 = sadd.s32 1, %s937_s23   ;;  %s1193_s18 = smov %s921_s19 }
 0x2bb   : > { %p19_p11 = scmp.ge.s32.totalorder %s22_s23, 4   ;;  %s1194_s19 = smov %s925_s20 }
 0x2bc   : > { %s1195_s20 = smov %s1034_s7  ;;  %s1196_s21 = smov %s933_s22 }
 0x2bd   : > { %s1197_s22 = smov %s1199_s26  ;;  %21 = sbr.rel (!%p19_p11) target bundleno = 6 (0x6), region = 105 }
 0x2c4   :  { %617 = vsyncpa [#allocation3], 1 }
 0x2c5   :  { %619 = vsyncpa [#allocation3 + $0x1], 1 }
 0x2c6   :  { %620 = vsyncpa [#allocation4], 1 }
 0x2c7   :  { %622 = vsyncpa [#allocation4 + $0x1], 1 }

</bundles_post_ra>
